<compile_context>
chip_gen: v6e
topology: v6e:2x2x1
jax: 0.10.0
libtpu: 0.0.40
codegen_flags: <defaults>
</compile_context>

<pallas_src>
import jax
import jax.numpy as jnp
from jax.experimental import pallas as pl
from jax.experimental.pallas import tpu as pltpu


# -----------------------------------------------------------------------------
# Kernel 1: tiled (M, K) @ (K, N) + bias.
# A 1x1 conv over NCHW == a per-token matmul over channels, so this kernel serves
# both the fused QKV projection and the output projection.
# -----------------------------------------------------------------------------
def _matmul_bias_kernel(x_ref, w_ref, b_ref, o_ref):
    x = x_ref[...].astype(jnp.float32)
    out = jnp.dot(x, w_ref[...].astype(jnp.float32),
                  preferred_element_type=jnp.float32) + b_ref[...]
    o_ref[...] = out.astype(o_ref.dtype)


def _pick_tile(n, candidates):
    for c in candidates:
        if n % c == 0:
            return c
    return n


def _matmul_bias(x, w, b):
    M, K = x.shape
    _, N = w.shape
    tm = _pick_tile(M, (1024, 512, 256, 128, 64, 32, 16, 8))
    grid = (M // tm,)
    return pl.pallas_call(
        _matmul_bias_kernel,
        out_shape=jax.ShapeDtypeStruct((M, N), x.dtype),
        grid_spec=pltpu.PrefetchScalarGridSpec(
            num_scalar_prefetch=0,
            grid=grid,
            in_specs=[
                pl.BlockSpec((tm, K), lambda i: (i, 0)),
                pl.BlockSpec((K, N), lambda i: (0, 0)),
                pl.BlockSpec((1, N), lambda i: (0, 0)),
            ],
            out_specs=pl.BlockSpec((tm, N), lambda i: (i, 0)),
        ),
        compiler_params=pltpu.CompilerParams(
            dimension_semantics=("parallel",)),
    )(x, w, b)


# -----------------------------------------------------------------------------
# Kernel 2: flash attention (online softmax) over the flattened global sequence.
#   q, k: (S, dk), v: (S, dv)  ->  o: (S, dv)
# -----------------------------------------------------------------------------
def _flash_attn_kernel(q_ref, k_ref, v_ref, o_ref, m_sc, l_sc, acc_sc):
    ki = pl.program_id(1)

    @pl.when(ki == 0)
    def _():
        m_sc[...] = jnp.full(m_sc.shape, -jnp.inf, jnp.float32)
        l_sc[...] = jnp.zeros(l_sc.shape, jnp.float32)
        acc_sc[...] = jnp.zeros(acc_sc.shape, jnp.float32)

    q = q_ref[...].astype(jnp.float32)
    k = k_ref[...].astype(jnp.float32)
    # scores (TQ, TK): contract the head dim; TK (lane axis) is a multiple of 128.
    s = jax.lax.dot_general(q, k, (((1,), (1,)), ((), ())),
                            preferred_element_type=jnp.float32)

    m_prev = m_sc[...]
    m_new = jnp.maximum(m_prev, s.max(axis=-1, keepdims=True))
    alpha = jnp.exp(m_prev - m_new)
    p = jnp.exp(s - m_new)
    l_sc[...] = alpha * l_sc[...] + p.sum(axis=-1, keepdims=True)
    acc_sc[...] = alpha * acc_sc[...] + jnp.dot(
        p, v_ref[...].astype(jnp.float32), preferred_element_type=jnp.float32)
    m_sc[...] = m_new

    @pl.when(ki == pl.num_programs(1) - 1)
    def _():
        o_ref[...] = (acc_sc[...] / l_sc[...]).astype(o_ref.dtype)


def _flash_attention(q, k, v):
    S, dk = q.shape
    dv = v.shape[1]
    tq = _pick_tile(S, (256, 128, 64, 32, 16, 8))
    tk = _pick_tile(S, (256, 128, 64, 32, 16, 8))
    grid = (S // tq, S // tk)
    return pl.pallas_call(
        _flash_attn_kernel,
        out_shape=jax.ShapeDtypeStruct((S, dv), q.dtype),
        grid_spec=pltpu.PrefetchScalarGridSpec(
            num_scalar_prefetch=0,
            grid=grid,
            in_specs=[
                pl.BlockSpec((tq, dk), lambda qi, ki: (qi, 0)),
                pl.BlockSpec((tk, dk), lambda qi, ki: (ki, 0)),
                pl.BlockSpec((tk, dv), lambda qi, ki: (ki, 0)),
            ],
            out_specs=pl.BlockSpec((tq, dv), lambda qi, ki: (qi, 0)),
            scratch_shapes=[
                pltpu.VMEM((tq, 1), jnp.float32),   # running max
                pltpu.VMEM((tq, 1), jnp.float32),   # running denom
                pltpu.VMEM((tq, dv), jnp.float32),  # output accumulator
            ],
        ),
        compiler_params=pltpu.CompilerParams(
            dimension_semantics=("parallel", "arbitrary")),
    )(q, k, v)


# -----------------------------------------------------------------------------
# Wrapper: full Multi_Head_Attention forward (SAME query transform, eval mode).
# -----------------------------------------------------------------------------
def multi_head_attention_forward(x_nchw, params, num_heads):
    """x_nchw: (B, C, H, W) float32.  Returns (B, output_filters, H, W)."""
    # TODO(synk): only query_transform_type='SAME' is implemented; 'DOWN'/'UP'/
    # 'Arbitrary' need strided / transposed conv or bilinear resize of q.
    # TODO(synk): attention dropout is eval-mode identity; training-mode
    # stochastic masking (and its RNG) is out of scope for this kernel.
    B, C, H, W = x_nchw.shape
    q_w, q_b = params["q_w"], params["q_b"]       # (Kf, C, 1, 1), (Kf,)
    k_w, k_b = params["k_w"], params["k_b"]
    v_w, v_b = params["v_w"], params["v_b"]
    o_w, o_b = params["out_w"], params["out_b"]   # (Of, Vf, 1, 1), (Of,)
    Kf = q_w.shape[0]
    Vf = v_w.shape[0]
    Of = o_w.shape[0]
    dk = Kf // num_heads
    dv = Vf // num_heads
    scale = float(dk) ** 0.5

    # NCHW -> token-major (B*H*W, C): channels on the lane axis for the projections
    # and for per-token attention vectors.
    x_tok = jnp.transpose(x_nchw, (0, 2, 3, 1)).reshape(B * H * W, C)

    # Fold the 1/sqrt(dk) query scaling into Wq / bq, fuse Q, K, V into ONE matmul.
    wq = q_w.reshape(Kf, C).T / scale
    bq = q_b / scale
    wk = k_w.reshape(Kf, C).T
    wv = v_w.reshape(Vf, C).T
    w_qkv = jnp.concatenate([wq, wk, wv], axis=1)                  # (C, 2*Kf + Vf)
    b_qkv = jnp.concatenate([bq, k_b, v_b]).reshape(1, -1)

    qkv = _matmul_bias(x_tok, w_qkv, b_qkv)                        # (Ntok, 2Kf+Vf)
    q_tok = qkv[:, :Kf]
    k_tok = qkv[:, Kf:2 * Kf]
    v_tok = qkv[:, 2 * Kf:]

    # Head split == row-major reshape (token, head*dk) -> (token*head, dk); this is
    # exactly torch's split_heads + flatten(0, 3): batch, H, W and heads share one
    # sequence axis, so attention is global across batch AND heads.
    S = B * H * W * num_heads
    q = q_tok.reshape(S, dk)
    k = k_tok.reshape(S, dk)
    v = v_tok.reshape(S, dv)

    o = _flash_attention(q, k, v)                                  # (S, dv)

    # Merge heads (== torch's O.view(B, H, W, heads*dv)), then the output 1x1 conv.
    o_tok = o.reshape(B * H * W, Vf)
    wo = o_w.reshape(Of, Vf).T
    out_tok = _matmul_bias(o_tok, wo, o_b.reshape(1, Of))          # (Ntok, Of)

    return out_tok.reshape(B, H, W, Of).transpose(0, 3, 1, 2)


# -----------------------------------------------------------------------------
# Parameter init + pure-JAX reference (direct transcription of the torch forward)
# -----------------------------------------------------------------------------
def init_params(key, in_channel, key_filters, value_filters, output_filters):
    ks = jax.random.split(key, 8)

    def conv_init(kw, kb, out_c, in_c):
        w = 0.1 * jax.random.normal(kw, (out_c, in_c, 1, 1), jnp.float32)
        b = 0.1 * jax.random.normal(kb, (out_c,), jnp.float32)
        return w, b

    q_w, q_b = conv_init(ks[0], ks[1], key_filters, in_channel)
    k_w, k_b = conv_init(ks[2], ks[3], key_filters, in_channel)
    v_w, v_b = conv_init(ks[4], ks[5], value_filters, in_channel)
    out_w, out_b = conv_init(ks[6], ks[7], output_filters, value_filters)
    return {"q_w": q_w, "q_b": q_b, "k_w": k_w, "k_b": k_b,
            "v_w": v_w, "v_b": v_b, "out_w": out_w, "out_b": out_b}


def reference_forward(x, p, num_heads):
    B, C, H, W = x.shape

    def conv1x1(t, w, b):
        return (jnp.einsum("bchw,oc->bohw", t, w.reshape(w.shape[0], -1))
                + b[None, :, None, None])

    q = conv1x1(x, p["q_w"], p["q_b"])
    k = conv1x1(x, p["k_w"], p["k_b"])
    v = conv1x1(x, p["v_w"], p["v_b"])
    Kf, Vf = q.shape[1], v.shape[1]
    dk, dv = Kf // num_heads, Vf // num_heads
    qf = jnp.transpose(q, (0, 2, 3, 1)).reshape(-1, dk) / (dk ** 0.5)
    kf = jnp.transpose(k, (0, 2, 3, 1)).reshape(-1, dk)
    vf = jnp.transpose(v, (0, 2, 3, 1)).reshape(-1, dv)
    A = jax.nn.softmax(qf @ kf.T, axis=1)          # dropout == identity in eval
    O = A @ vf
    O = O.reshape(B, H, W, Vf).transpose(0, 3, 1, 2)
    return conv1x1(O, p["out_w"], p["out_b"])


if __name__ == "__main__":
    key = jax.random.PRNGKey(0)
    kx, kp = jax.random.split(key)

    B, C, H, W = 2, 4, 16, 16
    key_filters = 8
    value_filters = 8
    output_filters = 8
    num_heads = 2

    x = jax.random.normal(kx, (B, C, H, W), jnp.float32)
    params = init_params(kp, C, key_filters, value_filters, output_filters)

    out = multi_head_attention_forward(x, params, num_heads)
    out = jax.block_until_ready(out)

    ref = reference_forward(x, params, num_heads)
    assert out.shape == (B, output_filters, H, W)
    assert jnp.allclose(out, ref, atol=1e-4, rtol=1e-4), (
        float(jnp.max(jnp.abs(out - ref))))

    print("KERNEL_OK")
</pallas_src>

<mosaic_0001>
module attributes {stable_mosaic.version = 11 : i64} {
  func.func @_matmul_bias_kernel(%arg0: i32, %arg1: memref<512x4xf32, #tpu.memory_space<vmem>>, %arg2: memref<4x24xf32, #tpu.memory_space<vmem>>, %arg3: memref<1x24xf32, #tpu.memory_space<vmem>>, %arg4: memref<512x24xf32, #tpu.memory_space<vmem>>) attributes {dimension_semantics = [#tpu.dimension_semantics<parallel>], iteration_bounds = array<i64: 1>, scalar_prefetch = 0 : i64, scratch_operands = 0 : i64, tpu.core_type = #tpu.core_type<tc>, window_params = [{transform_indices = @transform_0, window_bounds = array<i64: 512, 4>}, {pipeline_mode = #tpu.pipeline_mode<synchronous>, transform_indices = @transform_1, window_bounds = array<i64: 4, 24>}, {pipeline_mode = #tpu.pipeline_mode<synchronous>, transform_indices = @transform_2, window_bounds = array<i64: 1, 24>}, {transform_indices = @transform_3, window_bounds = array<i64: 512, 24>}]} {
    %c0 = arith.constant 0 : index
    %c0_0 = arith.constant 0 : index
    %0 = vector.load %arg1[%c0, %c0_0] : memref<512x4xf32, #tpu.memory_space<vmem>>, vector<512x4xf32>
    %c0_1 = arith.constant 0 : index
    %c0_2 = arith.constant 0 : index
    %1 = vector.load %arg2[%c0_1, %c0_2] : memref<4x24xf32, #tpu.memory_space<vmem>>, vector<4x24xf32>
    %cst = arith.constant dense<0.000000e+00> : vector<512x24xf32>
    %2 = tpu.matmul %0, %1, %cst {dimension_numbers = #tpu.dot_dimension_numbers<[1], [0], [0], [1], [0, 0, 1, 1], [], []>} : vector<512x4xf32>, vector<4x24xf32>, vector<512x24xf32> -> vector<512x24xf32>
    %c0_3 = arith.constant 0 : index
    %c0_4 = arith.constant 0 : index
    %3 = vector.load %arg3[%c0_3, %c0_4] : memref<1x24xf32, #tpu.memory_space<vmem>>, vector<1x24xf32>
    %4 = vector.broadcast %3 : vector<1x24xf32> to vector<512x24xf32>
    %5 = arith.addf %2, %4 : vector<512x24xf32>
    %c0_5 = arith.constant 0 : index
    %c0_6 = arith.constant 0 : index
    %6 = vector.load %arg4[%c0_5, %c0_6] : memref<512x24xf32, #tpu.memory_space<vmem>>, vector<512x24xf32>
    tpu.vector_store %arg4[%c0_5, %c0_6], %5 {strides = array<i32>} : memref<512x24xf32, #tpu.memory_space<vmem>>, vector<512x24xf32>,
    return
  }
  func.func @transform_0(%arg0: i32) -> (i32, i32) {
    %c0_i32 = arith.constant 0 : i32
    %c0_i32_0 = arith.constant 0 : i32
    return %arg0, %c0_i32 : i32, i32
  }
  func.func @transform_1(%arg0: i32) -> (i32, i32) {
    %c0_i32 = arith.constant 0 : i32
    %c0_i32_0 = arith.constant 0 : i32
    %c0_i32_1 = arith.constant 0 : i32
    return %c0_i32, %c0_i32_0 : i32, i32
  }
  func.func @transform_2(%arg0: i32) -> (i32, i32) {
    %c0_i32 = arith.constant 0 : i32
    %c0_i32_0 = arith.constant 0 : i32
    %c0_i32_1 = arith.constant 0 : i32
    return %c0_i32, %c0_i32_0 : i32, i32
  }
  func.func @transform_3(%arg0: i32) -> (i32, i32) {
    %c0_i32 = arith.constant 0 : i32
    %c0_i32_0 = arith.constant 0 : i32
    return %arg0, %c0_i32 : i32, i32
  }
}

</mosaic_0001>

<bundles_post_ra>
// kernel: tpu_custom_call.1
= control target key start
LH: loop header
LB: loop body
LE: loop exit
PB: predicated region body
PF: predicated region fallthrough
CT: control target
= control target key end

     0   :  { %vm279_vm0 = vcmask 1043456   ;;  %vm86_vm1 = vcmask 31744   ;;  %vm668_vm2 = vcmask 195584   ;;  %s1572_s1 = inlined_call_operand.vmem [shape: f32[4,24], index: 1, kind: input, shape index: {}]   ;;  %s1573_s0 = inlined_call_operand.vmem [shape: f32[512,4], index: 0, kind: input, shape index: {}]   ;;  %s1574_s2 = inlined_call_operand.vmem [shape: f32[1,24], index: 2, kind: input, shape index: {}]   ;;  %s1575_s3 = inlined_call_operand.vmem [shape: f32[512,24], index: 3, kind: output, shape index: {}]  }
   0x1   :  { %v78_v0 = vld [vmem:[%s1572_s1] sm:$0xf]  ;;  %v15_v3 = vld [vmem:[%s1573_s0 + $0x8] sm:$0xff]  ;;  %v16_v5 = vld [vmem:[%s1573_s0 + $0x10] sm:$0xff] }
   0x2   :  { %v14_v1 = vld [vmem:[%s1573_s0] sm:$0xff]  ;;  %868 = vmatprep.subr.msk.mxu0 %vm279_vm0, %v78_v0  ;;  %966 = vmatprep.subr.msk.mxu1 %vm279_vm0, %v78_v0  ;;  %v47_v4 = vld [vmem:[%s1573_s0 + $0x108] sm:$0xff]  ;;  %v48_v6 = vld [vmem:[%s1573_s0 + $0x110] sm:$0xff] }
   0x3   :  { %v46_v2 = vld [vmem:[%s1573_s0 + $0x100] sm:$0xff]  ;;  %869 = vmatpush3.msk.msra.mxu0 %vm279_vm0, %v78_v0  ;;  %967 = vmatpush3.msk.msra.mxu1 %vm279_vm0, %v78_v0  ;;  %v17_v7 = vld [vmem:[%s1573_s0 + $0x18] sm:$0xff]  ;;  %v19_v11 = vld [vmem:[%s1573_s0 + $0x28] sm:$0xff] }
   0x4   :  { %870 = vmatprep.mubr.msk.f32.mxu0 %vm86_vm1, %v14_v1  ;;  %918 = vmatprep.mubr.msk.f32.mxu1 %vm86_vm1, %v46_v2  ;;  %v49_v8 = vld [vmem:[%s1573_s0 + $0x118] sm:$0xff]  ;;  %v18_v9 = vld [vmem:[%s1573_s0 + $0x20] sm:$0xff]  ;;  %v51_v12 = vld [vmem:[%s1573_s0 + $0x128] sm:$0xff] }
   0x5   :  { %871 = vmatmul.mubr.msk.f32.vlgmr.msra.gmra.mxu0 %vm86_vm1, %v15_v3  ;;  %919 = vmatmul.mubr.msk.f32.vlgmr.msra.gmra.mxu1 %vm86_vm1, %v47_v4  ;;  %v50_v10 = vld [vmem:[%s1573_s0 + $0x120] sm:$0xff]  ;;  %v20_v13 = vld [vmem:[%s1573_s0 + $0x30] sm:$0xff]  ;;  %v21_v15 = vld [vmem:[%s1573_s0 + $0x38] sm:$0xff] }
   0x6   :  { %873 = vmatprep.mubr.msk.f32.mxu0 %vm86_vm1, %v16_v5  ;;  %921 = vmatprep.mubr.msk.f32.mxu1 %vm86_vm1, %v48_v6  ;;  %v52_v14 = vld [vmem:[%s1573_s0 + $0x130] sm:$0xff]  ;;  %v53_v16 = vld [vmem:[%s1573_s0 + $0x138] sm:$0xff]  ;;  %v22_v17 = vld [vmem:[%s1573_s0 + $0x40] sm:$0xff] }
   0x7   :  { %v54_v18 = vld [vmem:[%s1573_s0 + $0x140] sm:$0xff]  ;;  %v23_v19 = vld [vmem:[%s1573_s0 + $0x48] sm:$0xff]  ;;  %v24_v21 = vld [vmem:[%s1573_s0 + $0x50] sm:$0xff] }
   0x8   :  { %v55_v20 = vld [vmem:[%s1573_s0 + $0x148] sm:$0xff]  ;;  %v56_v22 = vld [vmem:[%s1573_s0 + $0x150] sm:$0xff]  ;;  %v25_v23 = vld [vmem:[%s1573_s0 + $0x58] sm:$0xff] }
   0x9   :  { %874 = vmatmul.mubr.msk.f32.gmra.mxu0 %vm86_vm1, %v17_v7  ;;  %922 = vmatmul.mubr.msk.f32.gmra.mxu1 %vm86_vm1, %v49_v8  ;;  %v57_v24 = vld [vmem:[%s1573_s0 + $0x158] sm:$0xff]  ;;  %v26_v25 = vld [vmem:[%s1573_s0 + $0x60] sm:$0xff]  ;;  %v27_v27 = vld [vmem:[%s1573_s0 + $0x68] sm:$0xff] }
   0xa   :  { %876 = vmatprep.mubr.msk.f32.mxu0 %vm86_vm1, %v18_v9  ;;  %924 = vmatprep.mubr.msk.f32.mxu1 %vm86_vm1, %v50_v10  ;;  %v58_v26 = vld [vmem:[%s1573_s0 + $0x160] sm:$0xff]  ;;  %v59_v28 = vld [vmem:[%s1573_s0 + $0x168] sm:$0xff]  ;;  %v28_v29 = vld [vmem:[%s1573_s0 + $0x70] sm:$0xff] }
   0xb   :  { %v60_v30 = vld [vmem:[%s1573_s0 + $0x170] sm:$0xff]  ;;  %v29_v31 = vld [vmem:[%s1573_s0 + $0x78] sm:$0xff]  ;;  %v30_v33 = vld [vmem:[%s1573_s0 + $0x80] sm:$0xff] }
   0xc   :  { %v61_v32 = vld [vmem:[%s1573_s0 + $0x178] sm:$0xff]  ;;  %v62_v34 = vld [vmem:[%s1573_s0 + $0x180] sm:$0xff]  ;;  %v31_v35 = vld [vmem:[%s1573_s0 + $0x88] sm:$0xff] }
   0xd   :  { %877 = vmatmul.mubr.msk.f32.gmra.mxu0 %vm86_vm1, %v19_v11  ;;  %925 = vmatmul.mubr.msk.f32.gmra.mxu1 %vm86_vm1, %v51_v12  ;;  %v63_v36 = vld [vmem:[%s1573_s0 + $0x188] sm:$0xff]  ;;  %v32_v37 = vld [vmem:[%s1573_s0 + $0x90] sm:$0xff]  ;;  %v33_v39 = vld [vmem:[%s1573_s0 + $0x98] sm:$0xff] }
   0xe   :  { %879 = vmatprep.mubr.msk.f32.mxu0 %vm86_vm1, %v20_v13  ;;  %927 = vmatprep.mubr.msk.f32.mxu1 %vm86_vm1, %v52_v14  ;;  %v64_v38 = vld [vmem:[%s1573_s0 + $0x190] sm:$0xff]  ;;  %v65_v40 = vld [vmem:[%s1573_s0 + $0x198] sm:$0xff]  ;;  %v34_v41 = vld [vmem:[%s1573_s0 + $0xa0] sm:$0xff] }
   0xf   :  { %v66_v42 = vld [vmem:[%s1573_s0 + $0x1a0] sm:$0xff]  ;;  %v35_v43 = vld [vmem:[%s1573_s0 + $0xa8] sm:$0xff]  ;;  %v36_v45 = vld [vmem:[%s1573_s0 + $0xb0] sm:$0xff] }
  0x10   :  { %v67_v44 = vld [vmem:[%s1573_s0 + $0x1a8] sm:$0xff]  ;;  %v68_v46 = vld [vmem:[%s1573_s0 + $0x1b0] sm:$0xff]  ;;  %v37_v47 = vld [vmem:[%s1573_s0 + $0xb8] sm:$0xff] }
  0x11   :  { %880 = vmatmul.mubr.msk.f32.gmra.mxu0 %vm86_vm1, %v21_v15  ;;  %928 = vmatmul.mubr.msk.f32.gmra.mxu1 %vm86_vm1, %v53_v16  ;;  %v69_v48 = vld [vmem:[%s1573_s0 + $0x1b8] sm:$0xff]  ;;  %v38_v49 = vld [vmem:[%s1573_s0 + $0xc0] sm:$0xff]  ;;  %v39_v51 = vld [vmem:[%s1573_s0 + $0xc8] sm:$0xff] }
  0x12   :  { %882 = vmatprep.mubr.msk.f32.mxu0 %vm86_vm1, %v22_v17  ;;  %930 = vmatprep.mubr.msk.f32.mxu1 %vm86_vm1, %v54_v18  ;;  %v70_v50 = vld [vmem:[%s1573_s0 + $0x1c0] sm:$0xff]  ;;  %v71_v52 = vld [vmem:[%s1573_s0 + $0x1c8] sm:$0xff]  ;;  %v40_v53 = vld [vmem:[%s1573_s0 + $0xd0] sm:$0xff] }
  0x13   :  { %v72_v54 = vld [vmem:[%s1573_s0 + $0x1d0] sm:$0xff]  ;;  %v41_v55 = vld [vmem:[%s1573_s0 + $0xd8] sm:$0xff]  ;;  %v42_v57 = vld [vmem:[%s1573_s0 + $0xe0] sm:$0xff] }
  0x14   :  { %v73_v56 = vld [vmem:[%s1573_s0 + $0x1d8] sm:$0xff]  ;;  %v74_v58 = vld [vmem:[%s1573_s0 + $0x1e0] sm:$0xff]  ;;  %v43_v59 = vld [vmem:[%s1573_s0 + $0xe8] sm:$0xff] }
  0x15   :  { %883 = vmatmul.mubr.msk.f32.gmra.mxu0 %vm86_vm1, %v23_v19  ;;  %931 = vmatmul.mubr.msk.f32.gmra.mxu1 %vm86_vm1, %v55_v20  ;;  %v75_v60 = vld [vmem:[%s1573_s0 + $0x1e8] sm:$0xff]  ;;  %v44_v61 = vld [vmem:[%s1573_s0 + $0xf0] sm:$0xff]  ;;  %v45_v63 = vld [vmem:[%s1573_s0 + $0xf8] sm:$0xff] }
  0x16   :  { %885 = vmatprep.mubr.msk.f32.mxu0 %vm86_vm1, %v24_v21  ;;  %933 = vmatprep.mubr.msk.f32.mxu1 %vm86_vm1, %v56_v22  ;;  %v76_v62 = vld [vmem:[%s1573_s0 + $0x1f0] sm:$0xff]  ;;  %v77_v0 = vld [vmem:[%s1573_s0 + $0x1f8] sm:$0xff]  ;;  %v1250_v1 = vld [vmem:[%s1574_s2] ss:$0 sm:$0xff] }
  0x19   :  { %886 = vmatmul.mubr.msk.f32.gmra.mxu0 %vm86_vm1, %v25_v23  ;;  %934 = vmatmul.mubr.msk.f32.gmra.mxu1 %vm86_vm1, %v57_v24 }
  0x1a   :  { %888 = vmatprep.mubr.msk.f32.mxu0 %vm86_vm1, %v26_v25  ;;  %936 = vmatprep.mubr.msk.f32.mxu1 %vm86_vm1, %v58_v26 }
  0x1d   :  { %889 = vmatmul.mubr.msk.f32.gmra.mxu0 %vm86_vm1, %v27_v27  ;;  %937 = vmatmul.mubr.msk.f32.gmra.mxu1 %vm86_vm1, %v59_v28 }
  0x1e   :  { %891 = vmatprep.mubr.msk.f32.mxu0 %vm86_vm1, %v28_v29  ;;  %939 = vmatprep.mubr.msk.f32.mxu1 %vm86_vm1, %v60_v30 }
  0x21   :  { %892 = vmatmul.mubr.msk.f32.gmra.mxu0 %vm86_vm1, %v29_v31  ;;  %940 = vmatmul.mubr.msk.f32.gmra.mxu1 %vm86_vm1, %v61_v32 }
  0x22   :  { %894 = vmatprep.mubr.msk.f32.mxu0 %vm86_vm1, %v30_v33  ;;  %942 = vmatprep.mubr.msk.f32.mxu1 %vm86_vm1, %v62_v34 }
  0x25   :  { %895 = vmatmul.mubr.msk.f32.gmra.mxu0 %vm86_vm1, %v31_v35  ;;  %943 = vmatmul.mubr.msk.f32.gmra.mxu1 %vm86_vm1, %v63_v36 }
  0x26   :  { %897 = vmatprep.mubr.msk.f32.mxu0 %vm86_vm1, %v32_v37  ;;  %945 = vmatprep.mubr.msk.f32.mxu1 %vm86_vm1, %v64_v38 }
  0x29   :  { %898 = vmatmul.mubr.msk.f32.gmra.mxu0 %vm86_vm1, %v33_v39  ;;  %946 = vmatmul.mubr.msk.f32.gmra.mxu1 %vm86_vm1, %v65_v40 }
  0x2a   :  { %900 = vmatprep.mubr.msk.f32.mxu0 %vm86_vm1, %v34_v41  ;;  %948 = vmatprep.mubr.msk.f32.mxu1 %vm86_vm1, %v66_v42 }
  0x2d   :  { %901 = vmatmul.mubr.msk.f32.gmra.mxu0 %vm86_vm1, %v35_v43  ;;  %949 = vmatmul.mubr.msk.f32.gmra.mxu1 %vm86_vm1, %v67_v44 }
  0x2e   :  { %903 = vmatprep.mubr.msk.f32.mxu0 %vm86_vm1, %v36_v45  ;;  %951 = vmatprep.mubr.msk.f32.mxu1 %vm86_vm1, %v68_v46 }
  0x31   :  { %904 = vmatmul.mubr.msk.f32.gmra.mxu0 %vm86_vm1, %v37_v47  ;;  %952 = vmatmul.mubr.msk.f32.gmra.mxu1 %vm86_vm1, %v69_v48 }
  0x32   :  { %906 = vmatprep.mubr.msk.f32.mxu0 %vm86_vm1, %v38_v49  ;;  %954 = vmatprep.mubr.msk.f32.mxu1 %vm86_vm1, %v70_v50 }
  0x35   :  { %907 = vmatmul.mubr.msk.f32.gmra.mxu0 %vm86_vm1, %v39_v51  ;;  %955 = vmatmul.mubr.msk.f32.gmra.mxu1 %vm86_vm1, %v71_v52 }
  0x36   :  { %909 = vmatprep.mubr.msk.f32.mxu0 %vm86_vm1, %v40_v53  ;;  %957 = vmatprep.mubr.msk.f32.mxu1 %vm86_vm1, %v72_v54 }
  0x39   :  { %910 = vmatmul.mubr.msk.f32.gmra.mxu0 %vm86_vm1, %v41_v55  ;;  %958 = vmatmul.mubr.msk.f32.gmra.mxu1 %vm86_vm1, %v73_v56 }
  0x3a   :  { %912 = vmatprep.mubr.msk.f32.mxu0 %vm86_vm1, %v42_v57  ;;  %960 = vmatprep.mubr.msk.f32.mxu1 %vm86_vm1, %v74_v58 }
  0x3d   :  { %913 = vmatmul.mubr.msk.f32.gmra.mxu0 %vm86_vm1, %v43_v59  ;;  %961 = vmatmul.mubr.msk.f32.gmra.mxu1 %vm86_vm1, %v75_v60 }
  0x3e   :  { %915 = vmatprep.mubr.msk.f32.mxu0 %vm86_vm1, %v44_v61  ;;  %963 = vmatprep.mubr.msk.f32.mxu1 %vm86_vm1, %v76_v62 }
  0x41   :  { %916 = vmatmul.mubr.msk.f32.gmra.mxu0 %vm86_vm1, %v45_v63  ;;  %964 = vmatmul.mubr.msk.f32.gmra.mxu1 %vm86_vm1, %v77_v0 }
  0xc5   :  { %v872_v2 = vpop.f32.mrf.mxu0  ;;  %v920_v3 = vpop.f32.mrf.mxu1 }
  0xc6   :  { %v355_v4 = vadd.f32 %v872_v2, %v1250_v1  ;;  %v515_v5 = vadd.f32 %v920_v3, %v1250_v1 }
  0xc7   :  { %v349_v6 = vpop.f32.mrf.mxu0  ;;  %v509_v7 = vpop.f32.mrf.mxu1 }
  0xc8   :  { %670 = vst.msk [vmem:[%s1575_s3 + $0x8] sm:$0xff] %vm668_vm2, %v355_v4  ;;  %702 = vst.msk [vmem:[%s1575_s3 + $0x108] sm:$0xff] %vm668_vm2, %v515_v5  ;;  %v350_v8 = vadd.f32 %v1250_v1, %v349_v6  ;;  %v510_v9 = vadd.f32 %v1250_v1, %v509_v7 }
  0xc9   :  { %v875_v10 = vpop.f32.mrf.mxu0  ;;  %v923_v11 = vpop.f32.mrf.mxu1 }
  0xca   :  { %669 = vst.msk [vmem:[%s1575_s3] sm:$0xff] %vm668_vm2, %v350_v8  ;;  %701 = vst.msk [vmem:[%s1575_s3 + $0x100] sm:$0xff] %vm668_vm2, %v510_v9  ;;  %v365_v12 = vadd.f32 %v875_v10, %v1250_v1  ;;  %v525_v13 = vadd.f32 %v923_v11, %v1250_v1 }
  0xcb   :  { %v359_v14 = vpop.f32.mrf.mxu0  ;;  %v519_v15 = vpop.f32.mrf.mxu1 }
  0xcc   :  { %672 = vst.msk [vmem:[%s1575_s3 + $0x18] sm:$0xff] %vm668_vm2, %v365_v12  ;;  %704 = vst.msk [vmem:[%s1575_s3 + $0x118] sm:$0xff] %vm668_vm2, %v525_v13  ;;  %v360_v16 = vadd.f32 %v1250_v1, %v359_v14  ;;  %v520_v17 = vadd.f32 %v1250_v1, %v519_v15 }
  0xcd   :  { %v878_v18 = vpop.f32.mrf.mxu0  ;;  %v926_v19 = vpop.f32.mrf.mxu1 }
  0xce   :  { %671 = vst.msk [vmem:[%s1575_s3 + $0x10] sm:$0xff] %vm668_vm2, %v360_v16  ;;  %703 = vst.msk [vmem:[%s1575_s3 + $0x110] sm:$0xff] %vm668_vm2, %v520_v17  ;;  %v375_v20 = vadd.f32 %v878_v18, %v1250_v1  ;;  %v535_v21 = vadd.f32 %v926_v19, %v1250_v1 }
  0xcf   :  { %v369_v22 = vpop.f32.mrf.mxu0  ;;  %v529_v23 = vpop.f32.mrf.mxu1 }
  0xd0   :  { %674 = vst.msk [vmem:[%s1575_s3 + $0x28] sm:$0xff] %vm668_vm2, %v375_v20  ;;  %706 = vst.msk [vmem:[%s1575_s3 + $0x128] sm:$0xff] %vm668_vm2, %v535_v21  ;;  %v370_v24 = vadd.f32 %v1250_v1, %v369_v22  ;;  %v530_v25 = vadd.f32 %v1250_v1, %v529_v23 }
  0xd1   :  { %v881_v26 = vpop.f32.mrf.mxu0  ;;  %v929_v27 = vpop.f32.mrf.mxu1 }
  0xd2   :  { %673 = vst.msk [vmem:[%s1575_s3 + $0x20] sm:$0xff] %vm668_vm2, %v370_v24  ;;  %705 = vst.msk [vmem:[%s1575_s3 + $0x120] sm:$0xff] %vm668_vm2, %v530_v25  ;;  %v385_v28 = vadd.f32 %v881_v26, %v1250_v1  ;;  %v545_v29 = vadd.f32 %v929_v27, %v1250_v1 }
  0xd3   :  { %v379_v30 = vpop.f32.mrf.mxu0  ;;  %v539_v31 = vpop.f32.mrf.mxu1 }
  0xd4   :  { %676 = vst.msk [vmem:[%s1575_s3 + $0x38] sm:$0xff] %vm668_vm2, %v385_v28  ;;  %708 = vst.msk [vmem:[%s1575_s3 + $0x138] sm:$0xff] %vm668_vm2, %v545_v29  ;;  %v380_v32 = vadd.f32 %v1250_v1, %v379_v30  ;;  %v540_v33 = vadd.f32 %v1250_v1, %v539_v31 }
  0xd5   :  { %v884_v34 = vpop.f32.mrf.mxu0  ;;  %v932_v35 = vpop.f32.mrf.mxu1 }
  0xd6   :  { %675 = vst.msk [vmem:[%s1575_s3 + $0x30] sm:$0xff] %vm668_vm2, %v380_v32  ;;  %707 = vst.msk [vmem:[%s1575_s3 + $0x130] sm:$0xff] %vm668_vm2, %v540_v33  ;;  %v395_v36 = vadd.f32 %v884_v34, %v1250_v1  ;;  %v555_v37 = vadd.f32 %v932_v35, %v1250_v1 }
  0xd7   :  { %v389_v38 = vpop.f32.mrf.mxu0  ;;  %v549_v39 = vpop.f32.mrf.mxu1 }
  0xd8   :  { %678 = vst.msk [vmem:[%s1575_s3 + $0x48] sm:$0xff] %vm668_vm2, %v395_v36  ;;  %710 = vst.msk [vmem:[%s1575_s3 + $0x148] sm:$0xff] %vm668_vm2, %v555_v37  ;;  %v390_v40 = vadd.f32 %v1250_v1, %v389_v38  ;;  %v550_v41 = vadd.f32 %v1250_v1, %v549_v39 }
  0xd9   :  { %v887_v42 = vpop.f32.mrf.mxu0  ;;  %v935_v43 = vpop.f32.mrf.mxu1 }
  0xda   :  { %677 = vst.msk [vmem:[%s1575_s3 + $0x40] sm:$0xff] %vm668_vm2, %v390_v40  ;;  %709 = vst.msk [vmem:[%s1575_s3 + $0x140] sm:$0xff] %vm668_vm2, %v550_v41  ;;  %v405_v44 = vadd.f32 %v887_v42, %v1250_v1  ;;  %v565_v45 = vadd.f32 %v935_v43, %v1250_v1 }
  0xdb   :  { %v399_v46 = vpop.f32.mrf.mxu0  ;;  %v559_v47 = vpop.f32.mrf.mxu1 }
  0xdc   :  { %680 = vst.msk [vmem:[%s1575_s3 + $0x58] sm:$0xff] %vm668_vm2, %v405_v44  ;;  %712 = vst.msk [vmem:[%s1575_s3 + $0x158] sm:$0xff] %vm668_vm2, %v565_v45  ;;  %v400_v48 = vadd.f32 %v1250_v1, %v399_v46  ;;  %v560_v49 = vadd.f32 %v1250_v1, %v559_v47 }
  0xdd   :  { %v890_v50 = vpop.f32.mrf.mxu0  ;;  %v938_v51 = vpop.f32.mrf.mxu1 }
  0xde   :  { %679 = vst.msk [vmem:[%s1575_s3 + $0x50] sm:$0xff] %vm668_vm2, %v400_v48  ;;  %711 = vst.msk [vmem:[%s1575_s3 + $0x150] sm:$0xff] %vm668_vm2, %v560_v49  ;;  %v415_v52 = vadd.f32 %v890_v50, %v1250_v1  ;;  %v575_v53 = vadd.f32 %v938_v51, %v1250_v1 }
  0xdf   :  { %v409_v54 = vpop.f32.mrf.mxu0  ;;  %v569_v55 = vpop.f32.mrf.mxu1 }
  0xe0   :  { %682 = vst.msk [vmem:[%s1575_s3 + $0x68] sm:$0xff] %vm668_vm2, %v415_v52  ;;  %714 = vst.msk [vmem:[%s1575_s3 + $0x168] sm:$0xff] %vm668_vm2, %v575_v53  ;;  %v410_v56 = vadd.f32 %v1250_v1, %v409_v54  ;;  %v570_v57 = vadd.f32 %v1250_v1, %v569_v55 }
  0xe1   :  { %v893_v58 = vpop.f32.mrf.mxu0  ;;  %v941_v59 = vpop.f32.mrf.mxu1 }
  0xe2   :  { %681 = vst.msk [vmem:[%s1575_s3 + $0x60] sm:$0xff] %vm668_vm2, %v410_v56  ;;  %713 = vst.msk [vmem:[%s1575_s3 + $0x160] sm:$0xff] %vm668_vm2, %v570_v57  ;;  %v425_v60 = vadd.f32 %v893_v58, %v1250_v1  ;;  %v585_v61 = vadd.f32 %v941_v59, %v1250_v1 }
  0xe3   :  { %v419_v62 = vpop.f32.mrf.mxu0  ;;  %v579_v63 = vpop.f32.mrf.mxu1 }
  0xe4   :  { %684 = vst.msk [vmem:[%s1575_s3 + $0x78] sm:$0xff] %vm668_vm2, %v425_v60  ;;  %716 = vst.msk [vmem:[%s1575_s3 + $0x178] sm:$0xff] %vm668_vm2, %v585_v61  ;;  %v420_v0 = vadd.f32 %v1250_v1, %v419_v62  ;;  %v580_v2 = vadd.f32 %v1250_v1, %v579_v63 }
  0xe5   :  { %v896_v3 = vpop.f32.mrf.mxu0  ;;  %v944_v4 = vpop.f32.mrf.mxu1 }
  0xe6   :  { %683 = vst.msk [vmem:[%s1575_s3 + $0x70] sm:$0xff] %vm668_vm2, %v420_v0  ;;  %715 = vst.msk [vmem:[%s1575_s3 + $0x170] sm:$0xff] %vm668_vm2, %v580_v2  ;;  %v435_v5 = vadd.f32 %v896_v3, %v1250_v1  ;;  %v595_v6 = vadd.f32 %v944_v4, %v1250_v1 }
  0xe7   :  { %v429_v7 = vpop.f32.mrf.mxu0  ;;  %v589_v8 = vpop.f32.mrf.mxu1 }
  0xe8   :  { %686 = vst.msk [vmem:[%s1575_s3 + $0x88] sm:$0xff] %vm668_vm2, %v435_v5  ;;  %718 = vst.msk [vmem:[%s1575_s3 + $0x188] sm:$0xff] %vm668_vm2, %v595_v6  ;;  %v430_v9 = vadd.f32 %v1250_v1, %v429_v7  ;;  %v590_v10 = vadd.f32 %v1250_v1, %v589_v8 }
  0xe9   :  { %v899_v11 = vpop.f32.mrf.mxu0  ;;  %v947_v12 = vpop.f32.mrf.mxu1 }
  0xea   :  { %685 = vst.msk [vmem:[%s1575_s3 + $0x80] sm:$0xff] %vm668_vm2, %v430_v9  ;;  %717 = vst.msk [vmem:[%s1575_s3 + $0x180] sm:$0xff] %vm668_vm2, %v590_v10  ;;  %v445_v13 = vadd.f32 %v899_v11, %v1250_v1  ;;  %v605_v14 = vadd.f32 %v947_v12, %v1250_v1 }
  0xeb   :  { %v439_v15 = vpop.f32.mrf.mxu0  ;;  %v599_v16 = vpop.f32.mrf.mxu1 }
  0xec   :  { %688 = vst.msk [vmem:[%s1575_s3 + $0x98] sm:$0xff] %vm668_vm2, %v445_v13  ;;  %720 = vst.msk [vmem:[%s1575_s3 + $0x198] sm:$0xff] %vm668_vm2, %v605_v14  ;;  %v440_v17 = vadd.f32 %v1250_v1, %v439_v15  ;;  %v600_v18 = vadd.f32 %v1250_v1, %v599_v16 }
  0xed   :  { %v902_v19 = vpop.f32.mrf.mxu0  ;;  %v950_v20 = vpop.f32.mrf.mxu1 }
  0xee   :  { %687 = vst.msk [vmem:[%s1575_s3 + $0x90] sm:$0xff] %vm668_vm2, %v440_v17  ;;  %719 = vst.msk [vmem:[%s1575_s3 + $0x190] sm:$0xff] %vm668_vm2, %v600_v18  ;;  %v455_v21 = vadd.f32 %v902_v19, %v1250_v1  ;;  %v615_v22 = vadd.f32 %v950_v20, %v1250_v1 }
  0xef   :  { %v449_v23 = vpop.f32.mrf.mxu0  ;;  %v609_v24 = vpop.f32.mrf.mxu1 }
  0xf0   :  { %690 = vst.msk [vmem:[%s1575_s3 + $0xa8] sm:$0xff] %vm668_vm2, %v455_v21  ;;  %722 = vst.msk [vmem:[%s1575_s3 + $0x1a8] sm:$0xff] %vm668_vm2, %v615_v22  ;;  %v450_v25 = vadd.f32 %v1250_v1, %v449_v23  ;;  %v610_v26 = vadd.f32 %v1250_v1, %v609_v24 }
  0xf1   :  { %v905_v27 = vpop.f32.mrf.mxu0  ;;  %v953_v28 = vpop.f32.mrf.mxu1 }
  0xf2   :  { %689 = vst.msk [vmem:[%s1575_s3 + $0xa0] sm:$0xff] %vm668_vm2, %v450_v25  ;;  %721 = vst.msk [vmem:[%s1575_s3 + $0x1a0] sm:$0xff] %vm668_vm2, %v610_v26  ;;  %v465_v29 = vadd.f32 %v905_v27, %v1250_v1  ;;  %v625_v30 = vadd.f32 %v953_v28, %v1250_v1 }
  0xf3   :  { %v459_v31 = vpop.f32.mrf.mxu0  ;;  %v619_v32 = vpop.f32.mrf.mxu1 }
  0xf4   :  { %692 = vst.msk [vmem:[%s1575_s3 + $0xb8] sm:$0xff] %vm668_vm2, %v465_v29  ;;  %724 = vst.msk [vmem:[%s1575_s3 + $0x1b8] sm:$0xff] %vm668_vm2, %v625_v30  ;;  %v460_v33 = vadd.f32 %v1250_v1, %v459_v31  ;;  %v620_v34 = vadd.f32 %v1250_v1, %v619_v32 }
  0xf5   :  { %v908_v35 = vpop.f32.mrf.mxu0  ;;  %v956_v36 = vpop.f32.mrf.mxu1 }
  0xf6   :  { %691 = vst.msk [vmem:[%s1575_s3 + $0xb0] sm:$0xff] %vm668_vm2, %v460_v33  ;;  %723 = vst.msk [vmem:[%s1575_s3 + $0x1b0] sm:$0xff] %vm668_vm2, %v620_v34  ;;  %v475_v37 = vadd.f32 %v908_v35, %v1250_v1  ;;  %v635_v38 = vadd.f32 %v956_v36, %v1250_v1 }
  0xf7   :  { %v469_v39 = vpop.f32.mrf.mxu0  ;;  %v629_v40 = vpop.f32.mrf.mxu1 }
  0xf8   :  { %694 = vst.msk [vmem:[%s1575_s3 + $0xc8] sm:$0xff] %vm668_vm2, %v475_v37  ;;  %726 = vst.msk [vmem:[%s1575_s3 + $0x1c8] sm:$0xff] %vm668_vm2, %v635_v38  ;;  %v470_v41 = vadd.f32 %v1250_v1, %v469_v39  ;;  %v630_v42 = vadd.f32 %v1250_v1, %v629_v40 }
  0xf9   :  { %v911_v43 = vpop.f32.mrf.mxu0  ;;  %v959_v44 = vpop.f32.mrf.mxu1 }
  0xfa   :  { %693 = vst.msk [vmem:[%s1575_s3 + $0xc0] sm:$0xff] %vm668_vm2, %v470_v41  ;;  %725 = vst.msk [vmem:[%s1575_s3 + $0x1c0] sm:$0xff] %vm668_vm2, %v630_v42  ;;  %v485_v45 = vadd.f32 %v911_v43, %v1250_v1  ;;  %v645_v46 = vadd.f32 %v959_v44, %v1250_v1 }
  0xfb   :  { %v479_v47 = vpop.f32.mrf.mxu0  ;;  %v639_v48 = vpop.f32.mrf.mxu1 }
  0xfc   :  { %696 = vst.msk [vmem:[%s1575_s3 + $0xd8] sm:$0xff] %vm668_vm2, %v485_v45  ;;  %728 = vst.msk [vmem:[%s1575_s3 + $0x1d8] sm:$0xff] %vm668_vm2, %v645_v46  ;;  %v480_v49 = vadd.f32 %v1250_v1, %v479_v47  ;;  %v640_v50 = vadd.f32 %v1250_v1, %v639_v48 }
  0xfd   :  { %v914_v51 = vpop.f32.mrf.mxu0  ;;  %v962_v52 = vpop.f32.mrf.mxu1 }
  0xfe   :  { %695 = vst.msk [vmem:[%s1575_s3 + $0xd0] sm:$0xff] %vm668_vm2, %v480_v49  ;;  %727 = vst.msk [vmem:[%s1575_s3 + $0x1d0] sm:$0xff] %vm668_vm2, %v640_v50  ;;  %v495_v53 = vadd.f32 %v914_v51, %v1250_v1  ;;  %v655_v54 = vadd.f32 %v962_v52, %v1250_v1 }
  0xff   :  { %v489_v55 = vpop.f32.mrf.mxu0  ;;  %v649_v56 = vpop.f32.mrf.mxu1 }
 0x100   :  { %698 = vst.msk [vmem:[%s1575_s3 + $0xe8] sm:$0xff] %vm668_vm2, %v495_v53  ;;  %730 = vst.msk [vmem:[%s1575_s3 + $0x1e8] sm:$0xff] %vm668_vm2, %v655_v54  ;;  %v490_v57 = vadd.f32 %v1250_v1, %v489_v55  ;;  %v650_v58 = vadd.f32 %v1250_v1, %v649_v56 }
 0x101   :  { %v917_v59 = vpop.f32.mrf.mxu0  ;;  %v965_v60 = vpop.f32.mrf.mxu1 }
 0x102   :  { %697 = vst.msk [vmem:[%s1575_s3 + $0xe0] sm:$0xff] %vm668_vm2, %v490_v57  ;;  %729 = vst.msk [vmem:[%s1575_s3 + $0x1e0] sm:$0xff] %vm668_vm2, %v650_v58  ;;  %v505_v61 = vadd.f32 %v917_v59, %v1250_v1  ;;  %v665_v62 = vadd.f32 %v965_v60, %v1250_v1 }
 0x103   :  { %v499_v63 = vpop.f32.mrf.mxu0  ;;  %v659_v0 = vpop.f32.mrf.mxu1 }
 0x104   :  { %700 = vst.msk [vmem:[%s1575_s3 + $0xf8] sm:$0xff] %vm668_vm2, %v505_v61  ;;  %732 = vst.msk [vmem:[%s1575_s3 + $0x1f8] sm:$0xff] %vm668_vm2, %v665_v62  ;;  %v500_v2 = vadd.f32 %v1250_v1, %v499_v63  ;;  %v660_v3 = vadd.f32 %v1250_v1, %v659_v0 }
 0x106   :  { %699 = vst.msk [vmem:[%s1575_s3 + $0xf0] sm:$0xff] %vm668_vm2, %v500_v2  ;;  %731 = vst.msk [vmem:[%s1575_s3 + $0x1f0] sm:$0xff] %vm668_vm2, %v660_v3 }

</bundles_post_ra>
